<compile_context>
chip_gen: v7x
topology: tpu7x:2x2x1
jax: 0.10.0
libtpu: 0.0.40
codegen_flags: <defaults>
</compile_context>

<pallas_src>
import jax
import jax.numpy as jnp
from jax.experimental import pallas as pl
from jax.experimental.pallas import tpu as pltpu


def ode_kernel(theta_ref, z_ref, out_ref):
    # theta_ref: (1, HT) block, z_ref/out_ref: (BT, HT) blocks.
    # Broadcast multiply == torch's `self.theta * z`, computed in the promoted
    # dtype (matches PyTorch type promotion), then cast to the output dtype.
    out_ref[...] = (z_ref[...] * theta_ref[...]).astype(out_ref.dtype)


def _round_up(x, m):
    return ((x + m - 1) // m) * m


def ode_forward(t, z, theta, *, batch_tile=None, hidden_tile=None,
                use_core_parallel=False):
    """Pallas implementation of ODE.forward(t, z) = theta * z.

    `t` is accepted for API parity with the PyTorch module but is unused.
    Tile sizes are chosen automatically (VMEM- and lane-aware) unless given.
    Set `use_core_parallel=True` on v7x to shard the leading grid axis across
    both TensorCores.
    """
    del t  # unused, exactly as in the reference module
    B, H = z.shape
    out_dtype = jnp.result_type(theta.dtype, z.dtype)
    auto_tiles = (batch_tile is None) and (hidden_tile is None)

    # --- Lane density: pad hidden axis to a multiple of 128 (sliced back). ---
    Hp = _round_up(H, 128)
    zp = z if Hp == H else jnp.pad(z, ((0, 0), (0, Hp - H)))
    thetap = theta if Hp == H else jnp.pad(theta, (0, Hp - H))

    # --- Lane fusion (auto mode): small H, B divisible by k -> (B//k, k*H). ---
    fused_k = 1
    Bf, Hf = B, Hp
    if auto_tiles and Hp <= 1024:
        k = 1
        while (k * 2) * Hp <= 2048 and B % (k * 2) == 0:
            k *= 2
        if k > 1:
            fused_k = k
            Bf, Hf = B // k, k * Hp
            zp = zp.reshape(Bf, Hf)
            thetap = jnp.tile(thetap, k)

    theta2d = thetap.reshape(1, Hf)
    z_itemsize = jnp.dtype(zp.dtype).itemsize
    out_itemsize = jnp.dtype(out_dtype).itemsize

    # --- Tile sizing ---------------------------------------------------------
    if hidden_tile is None:
        hidden_tile = min(Hf, 2048)          # Hf is always 128-aligned here
    if batch_tile is None:
        # Double-buffered z-in + out tiles must fit the budget (4 tile buffers
        # total, counting both dtypes). 12 MiB keeps v5e/v7x safe and is on the
        # measured roofline plateau for v6e.
        vmem_budget_bytes = 12 * 1024 * 1024
        per_row = 2 * hidden_tile * (z_itemsize + out_itemsize)
        rows = max(8, vmem_budget_bytes // per_row)
        batch_tile = min(Bf, int(rows))
        if batch_tile < Bf:
            batch_tile = max(8, (batch_tile // 8) * 8)

    b_tiles = pl.cdiv(Bf, batch_tile)
    h_tiles = pl.cdiv(Hf, hidden_tile)

    # Deeper buffering on z when tiles are tiny and there are many grid steps.
    z_kwargs = {}
    if batch_tile * hidden_tile * z_itemsize < (1 << 19) and b_tiles * h_tiles >= 8:
        z_kwargs = {"pipeline_mode": pl.Buffered(3)}

    # --- Grid / BlockSpecs ---------------------------------------------------
    if h_tiles == 1:
        # Common case: 1-D grid over batch only; theta is a single resident tile.
        grid = (b_tiles,)
        theta_spec = pl.BlockSpec((1, hidden_tile), lambda i: (0, 0))
        z_spec = pl.BlockSpec((batch_tile, hidden_tile), lambda i: (i, 0),
                              **z_kwargs)
        out_spec = pl.BlockSpec((batch_tile, hidden_tile), lambda i: (i, 0))
        semantics = ((pltpu.CORE_PARALLEL,) if use_core_parallel
                     else ("parallel",))
    else:
        # Hidden tiles OUTER, batch tiles INNER: theta's block index is constant
        # across the fast-moving inner axis, so it is re-fetched only h_tiles
        # times rather than every grid step.
        grid = (h_tiles, b_tiles)
        theta_spec = pl.BlockSpec((1, hidden_tile), lambda j, i: (0, j))
        z_spec = pl.BlockSpec((batch_tile, hidden_tile), lambda j, i: (i, j),
                              **z_kwargs)
        out_spec = pl.BlockSpec((batch_tile, hidden_tile), lambda j, i: (i, j))
        semantics = ((pltpu.CORE_PARALLEL, "parallel") if use_core_parallel
                     else ("parallel", "parallel"))

    out = pl.pallas_call(
        ode_kernel,
        out_shape=jax.ShapeDtypeStruct((Bf, Hf), out_dtype),
        grid_spec=pl.GridSpec(
            grid=grid,
            in_specs=[theta_spec, z_spec],
            out_specs=out_spec,
        ),
        compiler_params=pltpu.CompilerParams(
            dimension_semantics=semantics,
            # Explicit limit so v5e's 16 MiB scoped default never constrains us;
            # 32 MiB is within every generation's physical VMEM.
            vmem_limit_bytes=32 * 1024 * 1024,
        ),
    )(theta2d, zp)

    # --- Undo layout plumbing -------------------------------------------------
    if fused_k > 1:
        out = out.reshape(B, Hp)
    if Hp != H:
        out = out[:, :H]
    return out


if __name__ == "__main__":
    key = jax.random.PRNGKey(0)
    k1, k2, k3, k4, k5, k6, k7 = jax.random.split(key, 7)

    t = jnp.float32(0.0)  # unused by forward, kept for signature parity

    # --- 1) Small demo size (matches the module: per-unit theta, batched z). --
    B, H = 16, 128
    theta = jax.random.normal(k1, (H,), dtype=jnp.float32)   # nn.Parameter
    z = jax.random.normal(k2, (B, H), dtype=jnp.float32)
    out = jax.block_until_ready(ode_forward(t, z, theta))
    ref = theta[None, :] * z
    assert out.shape == ref.shape and out.dtype == ref.dtype
    assert jnp.allclose(out, ref, rtol=1e-6, atol=1e-6)

    # --- 2) Multi-tile 2-D grid path with explicit small tiles. ---------------
    B2, H2 = 256, 384
    theta2 = jax.random.normal(k3, (H2,), dtype=jnp.float32)
    z2 = jax.random.normal(k4, (B2, H2), dtype=jnp.float32)
    out2 = jax.block_until_ready(
        ode_forward(t, z2, theta2, batch_tile=64, hidden_tile=128))
    ref2 = theta2[None, :] * z2
    assert out2.shape == ref2.shape and out2.dtype == ref2.dtype
    assert jnp.allclose(out2, ref2, rtol=1e-6, atol=1e-6)

    # --- 3) Non-128-aligned hidden dim (exercises pad + slice path). ----------
    B3, H3 = 32, 100
    theta3 = jax.random.normal(k5, (H3,), dtype=jnp.float32)
    z3 = jax.random.normal(k6, (B3, H3), dtype=jnp.float32)
    out3 = jax.block_until_ready(ode_forward(t, z3, theta3))
    ref3 = theta3[None, :] * z3
    assert out3.shape == ref3.shape and out3.dtype == ref3.dtype
    assert jnp.allclose(out3, ref3, rtol=1e-6, atol=1e-6)

    # --- 4) bf16 activations with f32 parameter (PyTorch-style promotion). ----
    z4 = jax.random.normal(k7, (B, H), dtype=jnp.float32).astype(jnp.bfloat16)
    out4 = jax.block_until_ready(ode_forward(t, z4, theta))
    ref4 = theta[None, :] * z4          # promotes to f32, like torch
    assert out4.shape == ref4.shape and out4.dtype == ref4.dtype
    assert jnp.allclose(out4, ref4, rtol=1e-2, atol=1e-2)

    print("KERNEL_OK")
</pallas_src>

<mosaic_0001>
module attributes {stable_mosaic.version = 11 : i64} {
  func.func @ode_kernel(%arg0: i32, %arg1: memref<1x2048xf32, #tpu.memory_space<vmem>>, %arg2: memref<1x2048xf32, #tpu.memory_space<vmem>>, %arg3: memref<1x2048xf32, #tpu.memory_space<vmem>>) attributes {dimension_semantics = [#tpu.dimension_semantics<parallel>], iteration_bounds = array<i64: 1>, scalar_prefetch = 0 : i64, scratch_operands = 0 : i64, tpu.core_type = #tpu.core_type<tc>, window_params = [{pipeline_mode = #tpu.pipeline_mode<synchronous>, transform_indices = @transform_0, window_bounds = array<i64: 1, 2048>}, {transform_indices = @transform_1, window_bounds = array<i64: 1, 2048>}, {transform_indices = @transform_2, window_bounds = array<i64: 1, 2048>}]} {
    %c0 = arith.constant 0 : index
    %c0_0 = arith.constant 0 : index
    %0 = vector.load %arg2[%c0, %c0_0] : memref<1x2048xf32, #tpu.memory_space<vmem>>, vector<1x2048xf32>
    %c0_1 = arith.constant 0 : index
    %c0_2 = arith.constant 0 : index
    %1 = vector.load %arg1[%c0_1, %c0_2] : memref<1x2048xf32, #tpu.memory_space<vmem>>, vector<1x2048xf32>
    %2 = arith.mulf %0, %1 : vector<1x2048xf32>
    %c0_3 = arith.constant 0 : index
    %c0_4 = arith.constant 0 : index
    %3 = vector.load %arg3[%c0_3, %c0_4] : memref<1x2048xf32, #tpu.memory_space<vmem>>, vector<1x2048xf32>
    tpu.vector_store %arg3[%c0_3, %c0_4], %2 {strides = array<i32>} : memref<1x2048xf32, #tpu.memory_space<vmem>>, vector<1x2048xf32>,
    return
  }
  func.func @transform_0(%arg0: i32) -> (i32, i32) {
    %c0_i32 = arith.constant 0 : i32
    %c0_i32_0 = arith.constant 0 : i32
    %c0_i32_1 = arith.constant 0 : i32
    return %c0_i32, %c0_i32_0 : i32, i32
  }
  func.func @transform_1(%arg0: i32) -> (i32, i32) {
    %c0_i32 = arith.constant 0 : i32
    %c0_i32_0 = arith.constant 0 : i32
    return %arg0, %c0_i32 : i32, i32
  }
  func.func @transform_2(%arg0: i32) -> (i32, i32) {
    %c0_i32 = arith.constant 0 : i32
    %c0_i32_0 = arith.constant 0 : i32
    return %arg0, %c0_i32 : i32, i32
  }
}

</mosaic_0001>

<bundles_post_ra>
// kernel: tpu_custom_call.1
= control target key start
LH: loop header
LB: loop body
LE: loop exit
PB: predicated region body
PF: predicated region fallthrough
CT: control target
= control target key end

     0   :  { %7 = vsyncpa [#allocation3], 0  ;;  %s189_s0 = inlined_call_operand.hbm [shape: f32[1,2048], index: 0, kind: input, shape index: {}]   ;;  %s190_s1 = inlined_call_operand.hbm [shape: f32[1,2048], index: 1, kind: input, shape index: {}]   ;;  %s191_s2 = inlined_call_operand.hbm [shape: f32[1,2048], index: 2, kind: output, shape index: {}]  }
   0x1   :  { %8 = vsyncpa [#allocation6], 0 }
   0x2   :  { %9 = vsyncpa [#allocation4], 0  ;;  %s135_s9 = smov [#allocation2]   ;;  %s136_s11 = smov [#allocation5]  }
   0x3   :  { %s16_s10 = sshll.u32 %s135_s9, 4  ;;  %s26_s12 = sshll.u32 %s136_s11, 4  ;;  %s17_s10 = int_to_ptr.vmem [resolvable:$true] %s16_s10  ;;  %s27_s12 = int_to_ptr.vmem [resolvable:$true] %s26_s12 }
   0x4   :  { %s63_s15 = scalar_lea.hbm %s189_s0, 256 }
   0x5   :  { %p64_p0 = scmp.ne.s32.totalorder %s189_s0, %s63_s15  ;;  %p67_p1 = scmp.lt.u32.totalorder %s63_s15, %s189_s0 }
   0x7   :  { %p69_p2 = pnand %p67_p1, %p64_p0 }
   0x9   :  { %72 = shalt.err (!%p69_p2)
}
   0xa   :  { %s73_s20 = scalar_lea.vmem %s17_s10, 256  ;;  %p78_p4 = scmp.lt.s32.totalorder %s17_s10, %s17_s10 }
   0xb   :  { %p74_p3 = scmp.ne.s32.totalorder %s17_s10, %s73_s20  ;;  %p79_p5 = scmp.lt.s32.totalorder %s73_s20, %s73_s20 }
   0xd   :  { %p80_p6 = por %p79_p5, %p78_p4 }
   0xf   :  { %p81_p7 = pnand %p80_p6, %p74_p3 }
  0x11   :  { %84 = shalt.err (!%p81_p7)
}
  0x12   :  { %19 = dma.hbm_to_vmem [thread:$0]  %s189_s0, 256, %s17_s10, [#allocation3]  }
  0x13   :  { %s85_s25 = scalar_lea.hbm %s190_s1, 256 }
  0x14   :  { %p86_p8 = scmp.ne.s32.totalorder %s190_s1, %s85_s25  ;;  %p89_p9 = scmp.lt.u32.totalorder %s85_s25, %s190_s1 }
  0x16   :  { %p91_p10 = pnand %p89_p9, %p86_p8 }
  0x18   :  { %94 = shalt.err (!%p91_p10)
}
  0x19   :  { %s95_s30 = scalar_lea.vmem %s27_s12, 256  ;;  %p100_p12 = scmp.lt.s32.totalorder %s27_s12, %s27_s12 }
  0x1a   :  { %p96_p11 = scmp.ne.s32.totalorder %s27_s12, %s95_s30  ;;  %p101_p13 = scmp.lt.s32.totalorder %s95_s30, %s95_s30 }
  0x1c   :  { %p102_p0 = por %p101_p13, %p100_p12 }
  0x1e   :  { %p103_p1 = pnand %p102_p0, %p96_p11 }
  0x20   :  { %106 = shalt.err (!%p103_p1)
}
  0x21   :  { %29 = dma.hbm_to_vmem [thread:$0]  %s190_s1, 256, %s27_s12, [#allocation6]  }
  0x22   :  { %129 = dma.done.wait [#allocation3], 256  }
  0x23   :  { %130 = vsyncadd [#allocation3], 4294967040 }
  0x24   :  { %131 = dma.done.wait [#allocation6], 256  }
  0x25   :  { %132 = vsyncadd [#allocation6], 4294967040  ;;  %s137_s4 = smov [#allocation7]   ;;  %v36_v0 = vld [vmem:[#allocation5] sm:$0xff]  ;;  %v38_v1 = vld [vmem:[#allocation2] sm:$0xff] }
  0x26   :  { %s50_s5 = sshll.u32 %s137_s4, 4  ;;  %v37_v2 = vld [vmem:[#allocation5 + $0x8] sm:$0xff]  ;;  %v40_v3 = vmul.f32 %v38_v1, %v36_v0  ;;  %v39_v4 = vld [vmem:[#allocation2 + $0x8] sm:$0xff]  ;;  %s51_s5 = int_to_ptr.vmem [resolvable:$true] %s50_s5 }
  0x27   :  { %v41_v5 = vmul.f32 %v39_v4, %v37_v2  ;;  %s107_s6 = scalar_lea.vmem %s51_s5, 256  ;;  %p112_p3 = scmp.lt.s32.totalorder %s51_s5, %s51_s5 }
  0x28   :  { %42 = vst [vmem:[#allocation7] sm:$0xff] %v40_v3  ;;  %p108_p2 = scmp.ne.s32.totalorder %s51_s5, %s107_s6  ;;  %p113_p4 = scmp.lt.s32.totalorder %s107_s6, %s107_s6 }
  0x29   :  { %43 = vst [vmem:[#allocation7 + $0x8] sm:$0xff] %v41_v5 }
  0x2a   :  { %p114_p5 = por %p113_p4, %p112_p3 }
  0x2c   :  { %p115_p6 = pnand %p114_p5, %p108_p2 }
  0x2e   :  { %118 = shalt.err (!%p115_p6)
}
  0x2f   :  { %s119_s8 = scalar_lea.hbm %s191_s2, 256 }
  0x30   :  { %p120_p7 = scmp.ne.s32.totalorder %s191_s2, %s119_s8  ;;  %p123_p8 = scmp.lt.u32.totalorder %s119_s8, %s191_s2 }
  0x32   :  { %p125_p9 = pnand %p123_p8, %p120_p7 }
  0x34   :  { %128 = shalt.err (!%p125_p9)
}
  0x35   :  { %53 = dma.vmem_to_hbm [thread:$0]  %s51_s5, 256, %s191_s2, [#allocation4]  }
  0x36   :  { %133 = dma.done.wait [#allocation4], 256  }
  0x37   :  { %134 = vsyncadd [#allocation4], 4294967040 }
  0x38   :  { %57 = vsyncpa [#allocation3], 1 }
  0x39   :  { %58 = vsyncpa [#allocation6], 1 }
  0x3a   :  { %59 = vsyncpa [#allocation4], 1 }

</bundles_post_ra>
